<compile_context>
chip_gen: v7x
topology: tpu7x:2x2x1
jax: 0.10.0
libtpu: 0.0.40
codegen_flags: <defaults>
</compile_context>

<pallas_src>
import jax
import jax.numpy as jnp
from jax.experimental import pallas as pl
from jax.experimental.pallas import tpu as pltpu

OUT_CLASSES = 10
OUT_PAD = 128          # lane-dense output slab (last dim multiple of 128)


def simple_nn_kernel(x_ref, w1_ref, w2_ref, o_ref):
    # x_ref:  (TB, input_dim)      f32   -- batch tile, streams over the grid
    # w1_ref: (input_dim, hidden)  bf16  -- resident across grid steps
    # w2_ref: (hidden, OUT_PAD)    bf16  -- zero-padded cols 10..127, resident
    # o_ref:  (TB, OUT_PAD)        bf16
    x_bf = x_ref[...].astype(jnp.bfloat16)                 # VPU cast, free under DMA
    h = jnp.dot(x_bf, w1_ref[...], preferred_element_type=jnp.float32)
    h = jnp.maximum(h, 0.0)                                # ReLU in f32
    y = jnp.dot(h.astype(jnp.bfloat16), w2_ref[...],
                preferred_element_type=jnp.float32)
    o_ref[...] = y.astype(o_ref.dtype)


def prepare_weights(w1, w2):
    """One-time weight prep (do at model init / load, not per call)."""
    input_dim, hidden_dim = w1.shape
    assert w2.shape == (hidden_dim, OUT_CLASSES)
    w1_bf = w1.astype(jnp.bfloat16)
    w2_pad = jnp.zeros((hidden_dim, OUT_PAD), jnp.bfloat16)
    w2_pad = w2_pad.at[:, :OUT_CLASSES].set(w2.astype(jnp.bfloat16))
    return w1_bf, w2_pad


def _pick_batch_tile(b, batch_tile):
    """Tile the batch so large B amortizes per-step overhead and the grid has
    >=2 steps whenever B > 8 (so both TCs on v7x contribute bandwidth)."""
    if b <= 8:
        return b                               # single step; tb == full dim is legal
    half = ((pl.cdiv(b, 2) + 7) // 8) * 8      # >=2 grid steps, multiple of 8
    return max(8, min(batch_tile, half))


def simple_nn_forward(x, w1_bf, w2_pad, *, batch_tile=1024):
    """x: (B, C, H, W) or (B, input_dim); w1_bf/w2_pad from prepare_weights().
    Returns (B, 10) float32 logits."""
    b = x.shape[0]
    x2d = x.reshape(b, -1)                     # free for contiguous NCHW; native dtype
    input_dim = x2d.shape[1]
    hidden_dim = w1_bf.shape[1]
    assert w1_bf.shape == (input_dim, hidden_dim)
    assert w2_pad.shape == (hidden_dim, OUT_PAD)

    tb = _pick_batch_tile(b, batch_tile)
    grid = (pl.cdiv(b, tb),)

    x_bytes = x2d.size * x2d.dtype.itemsize
    flops = 2 * b * input_dim * hidden_dim + 2 * b * hidden_dim * OUT_PAD
    bytes_accessed = (x_bytes + w1_bf.size * 2 + w2_pad.size * 2
                      + b * OUT_PAD * 2)

    out = pl.pallas_call(
        simple_nn_kernel,
        out_shape=jax.ShapeDtypeStruct((b, OUT_PAD), jnp.bfloat16),
        grid_spec=pltpu.PrefetchScalarGridSpec(
            num_scalar_prefetch=0,
            grid=grid,
            in_specs=[
                # batch tile marches over the grid (partial trailing block OK)
                pl.BlockSpec((tb, input_dim), lambda i: (i, 0)),
                # weights: constant index_map -> fetched once, stay in VMEM
                pl.BlockSpec((input_dim, hidden_dim), lambda i: (0, 0)),
                pl.BlockSpec((hidden_dim, OUT_PAD), lambda i: (0, 0)),
            ],
            out_specs=pl.BlockSpec((tb, OUT_PAD), lambda i: (i, 0)),
        ),
        compiler_params=pltpu.CompilerParams(
            # batch axis is independent -> shards across both TCs on v7x
            dimension_semantics=("parallel",),
        ),
        cost_estimate=pl.CostEstimate(
            flops=flops, transcendentals=0, bytes_accessed=bytes_accessed),
    )(x2d, w1_bf, w2_pad)

    # TODO(synk): if a consumer kernel exists, fuse this slice/cast into it
    # instead of running it as a standalone XLA op.
    return out[:, :OUT_CLASSES].astype(jnp.float32)


if __name__ == "__main__":
    # Small shapes consistent with the module: image-like NCHW input flattened
    # inside forward, hidden_dim=32, 10 output classes.
    B, C, H, W = 2, 4, 16, 16
    input_dim = C * H * W                  # 1024
    hidden_dim = 32

    key = jax.random.PRNGKey(0)
    kx, kw1, kw2 = jax.random.split(key, 3)

    x = jax.random.normal(kx, (B, C, H, W), dtype=jnp.float32)
    # nn.init.normal_ -> standard normal init (deterministic here via PRNGKey).
    w1 = jax.random.normal(kw1, (input_dim, hidden_dim), dtype=jnp.float32)
    w2 = jax.random.normal(kw2, (hidden_dim, 10), dtype=jnp.float32)

    # Weight prep hoisted out of the per-call path (done once).
    w1_bf, w2_pad = prepare_weights(w1, w2)

    y = simple_nn_forward(x, w1_bf, w2_pad)
    y = jax.block_until_ready(y)
    assert y.shape == (B, 10)
    assert y.dtype == jnp.float32

    # Reference along the same bf16-input / f32-accumulate / bf16-store path
    # (kernel only differs by MXU accumulation order -> tight tolerance).
    x2d = x.reshape(B, -1)
    h_ref = jnp.dot(x2d.astype(jnp.bfloat16), w1.astype(jnp.bfloat16),
                    preferred_element_type=jnp.float32)
    h_ref = jnp.maximum(h_ref, 0.0)
    y_ref = jnp.dot(h_ref.astype(jnp.bfloat16), w2.astype(jnp.bfloat16),
                    preferred_element_type=jnp.float32)
    y_ref_bf = y_ref.astype(jnp.bfloat16).astype(jnp.float32)
    assert jnp.allclose(y, y_ref_bf, atol=1.0, rtol=2e-2), \
        "mismatch vs bf16-path reference"

    # Loose check against the full-f32 math of the original module
    # (bf16 inputs + bf16 output store -> few-percent error expected).
    ref_f32 = jnp.maximum(x2d @ w1, 0.0) @ w2
    scale = jnp.max(jnp.abs(ref_f32))
    assert jnp.max(jnp.abs(y - ref_f32)) < 5e-2 * scale, \
        "mismatch vs f32 reference beyond bf16 tolerance"

    print("KERNEL_OK")
</pallas_src>

<mosaic_0001>
module attributes {stable_mosaic.version = 11 : i64} {
  func.func @simple_nn_kernel(%arg0: i32, %arg1: memref<2x1024xf32, #tpu.memory_space<vmem>>, %arg2: memref<1024x32xbf16, #tpu.memory_space<vmem>>, %arg3: memref<32x128xbf16, #tpu.memory_space<vmem>>, %arg4: memref<2x128xbf16, #tpu.memory_space<vmem>>) attributes {dimension_semantics = [#tpu.dimension_semantics<parallel>], iteration_bounds = array<i64: 1>, scalar_prefetch = 0 : i64, scratch_operands = 0 : i64, tpu.core_type = #tpu.core_type<tc>, window_params = [{transform_indices = @transform_0, window_bounds = array<i64: 2, 1024>}, {pipeline_mode = #tpu.pipeline_mode<synchronous>, transform_indices = @transform_1, window_bounds = array<i64: 1024, 32>}, {pipeline_mode = #tpu.pipeline_mode<synchronous>, transform_indices = @transform_2, window_bounds = array<i64: 32, 128>}, {transform_indices = @transform_3, window_bounds = array<i64: 2, 128>}]} {
    %c0 = arith.constant 0 : index
    %c0_0 = arith.constant 0 : index
    %0 = vector.load %arg1[%c0, %c0_0] : memref<2x1024xf32, #tpu.memory_space<vmem>>, vector<2x1024xf32>
    %1 = arith.truncf %0 : vector<2x1024xf32> to vector<2x1024xbf16>
    %c0_1 = arith.constant 0 : index
    %c0_2 = arith.constant 0 : index
    %2 = vector.load %arg2[%c0_1, %c0_2] : memref<1024x32xbf16, #tpu.memory_space<vmem>>, vector<1024x32xbf16>
    %cst = arith.constant dense<0.000000e+00> : vector<2x32xf32>
    %3 = tpu.matmul %1, %2, %cst {dimension_numbers = #tpu.dot_dimension_numbers<[1], [0], [0], [1], [0, 0, 1, 1], [], []>} : vector<2x1024xbf16>, vector<1024x32xbf16>, vector<2x32xf32> -> vector<2x32xf32>
    %cst_3 = arith.constant 0.000000e+00 : f32
    %4 = vector.broadcast %cst_3 : f32 to vector<2x32xf32>
    %5 = arith.maximumf %3, %4 : vector<2x32xf32>
    %6 = arith.truncf %5 : vector<2x32xf32> to vector<2x32xbf16>
    %c0_4 = arith.constant 0 : index
    %c0_5 = arith.constant 0 : index
    %7 = vector.load %arg3[%c0_4, %c0_5] : memref<32x128xbf16, #tpu.memory_space<vmem>>, vector<32x128xbf16>
    %cst_6 = arith.constant dense<0.000000e+00> : vector<2x128xf32>
    %8 = tpu.matmul %6, %7, %cst_6 {dimension_numbers = #tpu.dot_dimension_numbers<[1], [0], [0], [1], [0, 0, 1, 1], [], []>} : vector<2x32xbf16>, vector<32x128xbf16>, vector<2x128xf32> -> vector<2x128xf32>
    %9 = arith.truncf %8 : vector<2x128xf32> to vector<2x128xbf16>
    %c0_7 = arith.constant 0 : index
    %c0_8 = arith.constant 0 : index
    %10 = vector.load %arg4[%c0_7, %c0_8] : memref<2x128xbf16, #tpu.memory_space<vmem>>, vector<2x128xbf16>
    tpu.vector_store %arg4[%c0_7, %c0_8], %9 {strides = array<i32>} : memref<2x128xbf16, #tpu.memory_space<vmem>>, vector<2x128xbf16>,
    return
  }
  func.func @transform_0(%arg0: i32) -> (i32, i32) {
    %c0_i32 = arith.constant 0 : i32
    %c0_i32_0 = arith.constant 0 : i32
    return %arg0, %c0_i32 : i32, i32
  }
  func.func @transform_1(%arg0: i32) -> (i32, i32) {
    %c0_i32 = arith.constant 0 : i32
    %c0_i32_0 = arith.constant 0 : i32
    %c0_i32_1 = arith.constant 0 : i32
    return %c0_i32, %c0_i32_0 : i32, i32
  }
  func.func @transform_2(%arg0: i32) -> (i32, i32) {
    %c0_i32 = arith.constant 0 : i32
    %c0_i32_0 = arith.constant 0 : i32
    %c0_i32_1 = arith.constant 0 : i32
    return %c0_i32, %c0_i32_0 : i32, i32
  }
  func.func @transform_3(%arg0: i32) -> (i32, i32) {
    %c0_i32 = arith.constant 0 : i32
    %c0_i32_0 = arith.constant 0 : i32
    return %arg0, %c0_i32 : i32, i32
  }
}

</mosaic_0001>

<bundles_post_ra>
// kernel: tpu_custom_call.1
= control target key start
LH: loop header
LB: loop body
LE: loop exit
PB: predicated region body
PF: predicated region fallthrough
CT: control target
= control target key end

     0   :  { %v24_v28 = vlaneseq  ;;  %v1082_v36 = vmov 1983009808   ;;  %s1328_s0 = inlined_call_operand.vmem [shape: f32[2,1024], index: 0, kind: input, shape index: {}]   ;;  %s1329_s1 = inlined_call_operand.vmem [shape: bf16[1024,32], index: 1, kind: input, shape index: {}]   ;;  %s1330_s2 = inlined_call_operand.vmem [shape: bf16[32,128], index: 2, kind: input, shape index: {}]   ;;  %s1331_s3 = inlined_call_operand.hbm [shape: bf16[2,128], index: 3, kind: output, shape index: {}]  }
   0x1   :  { %v990_v0 = vld [vmem:[%s1329_s1 + $0x40] sm:$0xff]   ;;  %v994_v4 = vld [vmem:[%s1329_s1 + $0x48] sm:$0xff]   ;;  %v998_v8 = vld [vmem:[%s1329_s1 + $0x50] sm:$0xff]   ;;  %v22_v37 = vunpack.c.l.s4 %v1082_v36 }
   0x2   :  { %v991_v1 = vld [vmem:[%s1329_s1 + $0xc0] sm:$0xff]   ;;  %887 = vmatprep.subr.bf16.mxu0 %v990_v0  ;;  %v995_v5 = vld [vmem:[%s1329_s1 + $0xc8] sm:$0xff]   ;;  %v999_v9 = vld [vmem:[%s1329_s1 + $0xd0] sm:$0xff]   ;;  %v25_v33 = vshrl.u32 %v24_v28, 7 }
   0x3   :  { %v992_v2 = vld [vmem:[%s1329_s1] sm:$0xff]   ;;  %909 = vmatprep.subr.bf16.mxu1 %v991_v1  ;;  %v996_v6 = vld [vmem:[%s1329_s1 + $0x8] sm:$0xff]   ;;  %v1000_v10 = vld [vmem:[%s1329_s1 + $0x10] sm:$0xff]   ;;  %v23_v39 = vunpack.c.0.s8 %v22_v37 }
   0x4   :  { %v993_v3 = vld [vmem:[%s1329_s1 + $0x80] sm:$0xff]   ;;  %888 = vmatpush3.bf16.msra.mxu0 %v992_v2  ;;  %v997_v7 = vld [vmem:[%s1329_s1 + $0x88] sm:$0xff]   ;;  %v1001_v11 = vld [vmem:[%s1329_s1 + $0x90] sm:$0xff]  }
   0x5   :  { %910 = vmatpush3.bf16.msra.mxu1 %v993_v3  ;;  %889 = vmatprep.subr.bf16.mxu0 %v994_v4  ;;  %v1002_v12 = vld [vmem:[%s1329_s1 + $0x58] sm:$0xff]   ;;  %v1006_v16 = vld [vmem:[%s1329_s1 + $0x60] sm:$0xff]   ;;  %v1010_v20 = vld [vmem:[%s1329_s1 + $0x68] sm:$0xff]   ;;  %v1211_v41 = vsub.s32 %v23_v39, %v25_v33 }
   0x6   :  { %911 = vmatprep.subr.bf16.mxu1 %v995_v5  ;;  %v1003_v13 = vld [vmem:[%s1329_s1 + $0xd8] sm:$0xff]   ;;  %v1007_v17 = vld [vmem:[%s1329_s1 + $0xe0] sm:$0xff]   ;;  %v1011_v21 = vld [vmem:[%s1329_s1 + $0xe8] sm:$0xff]  }
   0x7   :  { %v1004_v14 = vld [vmem:[%s1329_s1 + $0x18] sm:$0xff]   ;;  %v1008_v18 = vld [vmem:[%s1329_s1 + $0x20] sm:$0xff]   ;;  %v1012_v22 = vld [vmem:[%s1329_s1 + $0x28] sm:$0xff]  }
   0x8   :  { %890 = vmatpush3.bf16.msra.mxu0 %v996_v6  ;;  %v1005_v15 = vld [vmem:[%s1329_s1 + $0x98] sm:$0xff]   ;;  %v1009_v19 = vld [vmem:[%s1329_s1 + $0xa0] sm:$0xff]   ;;  %v1013_v23 = vld [vmem:[%s1329_s1 + $0xa8] sm:$0xff]  }
   0x9   :  { %912 = vmatpush3.bf16.msra.mxu1 %v997_v7  ;;  %891 = vmatprep.subr.bf16.mxu0 %v998_v8  ;;  %v1014_v24 = vld [vmem:[%s1329_s1 + $0x70] sm:$0xff]   ;;  %v1018_v29 = vld [vmem:[%s1329_s1 + $0x78] sm:$0xff]   ;;  %v16_v34 = vld [vmem:[%s1328_s0] sm:$0xff] }
   0xa   :  { %913 = vmatprep.subr.bf16.mxu1 %v999_v9  ;;  %v1015_v25 = vld [vmem:[%s1329_s1 + $0xf0] sm:$0xff]   ;;  %v1019_v30 = vld [vmem:[%s1329_s1 + $0xf8] sm:$0xff]   ;;  %v1023_v35 = vld [vmem:[%s1329_s1 + $0x140] sm:$0xff]   ;;  %v20_v40 = vcombine.high %v16_v34, %v16_v34  ;;  %v27_v42 = vrot.slane %v16_v34, %v1211_v41 }
   0xb   :  { %v1016_v26 = vld [vmem:[%s1329_s1 + $0x30] sm:$0xff]   ;;  %v1020_v31 = vld [vmem:[%s1329_s1 + $0x38] sm:$0xff]   ;;  %v1024_v38 = vld [vmem:[%s1329_s1 + $0x1c0] sm:$0xff]  }
   0xc   :  { %892 = vmatpush3.bf16.msra.mxu0 %v1000_v10  ;;  %v1017_v27 = vld [vmem:[%s1329_s1 + $0xb0] sm:$0xff]   ;;  %v1021_v32 = vld [vmem:[%s1329_s1 + $0xb8] sm:$0xff]   ;;  %v34_v43 = vrot.slane %v20_v40, %v1211_v41  ;;  %v35_v44 = vcombine.high %v27_v42, %v27_v42  ;;  %v1025_v46 = vld [vmem:[%s1329_s1 + $0x100] sm:$0xff]   ;;  %v62_v47 = vpack.c.bf16 %v27_v42, %v27_v42 }
   0xd   :  { %914 = vmatpush3.bf16.msra.mxu1 %v1001_v11  ;;  %893 = vmatprep.subr.bf16.mxu0 %v1002_v12  ;;  %v1026_v49 = vld [vmem:[%s1329_s1 + $0x180] sm:$0xff]   ;;  %v1027_v52 = vld [vmem:[%s1329_s1 + $0x148] sm:$0xff]   ;;  %v1031_v56 = vld [vmem:[%s1329_s1 + $0x150] sm:$0xff]  }
   0xe   :  { %915 = vmatprep.subr.bf16.mxu1 %v1003_v13  ;;  %v36_v45 = vcombine.high %v34_v43, %v34_v43  ;;  %v64_v48 = vpack.c.bf16 %v34_v43, %v34_v43  ;;  %v63_v50 = vpack.c.bf16 %v35_v44, %v35_v44  ;;  %v1028_v53 = vld [vmem:[%s1329_s1 + $0x1c8] sm:$0xff]   ;;  %v1032_v57 = vld [vmem:[%s1329_s1 + $0x1d0] sm:$0xff]   ;;  %v1035_v60 = vld [vmem:[%s1329_s1 + $0x158] sm:$0xff]  }
   0xf   :  { %v1029_v54 = vld [vmem:[%s1329_s1 + $0x108] sm:$0xff]   ;;  %v1033_v58 = vld [vmem:[%s1329_s1 + $0x110] sm:$0xff]   ;;  %v1036_v61 = vld [vmem:[%s1329_s1 + $0x1d8] sm:$0xff]  }
  0x10   :  { %894 = vmatpush3.bf16.msra.mxu0 %v1004_v14  ;;  %v65_v51 = vpack.c.bf16 %v36_v45, %v36_v45  ;;  %614 = vmatprep.mubr.bf16.mxu0 %v63_v50  ;;  %v1030_v55 = vld [vmem:[%s1329_s1 + $0x188] sm:$0xff]   ;;  %v1034_v59 = vld [vmem:[%s1329_s1 + $0x190] sm:$0xff]   ;;  %v1037_v62 = vld [vmem:[%s1329_s1 + $0x118] sm:$0xff]  }
  0x11   :  { %916 = vmatpush3.bf16.msra.mxu1 %v1005_v15  ;;  %895 = vmatprep.subr.bf16.mxu0 %v1006_v16  ;;  %v1038_v63 = vld [vmem:[%s1329_s1 + $0x198] sm:$0xff]   ;;  %v1039_v0 = vld [vmem:[%s1329_s1 + $0x160] sm:$0xff]   ;;  %v1043_v4 = vld [vmem:[%s1329_s1 + $0x168] sm:$0xff]  }
  0x12   :  { %917 = vmatprep.subr.bf16.mxu1 %v1007_v17  ;;  %654 = vmatprep.mubr.bf16.mxu1 %v65_v51  ;;  %v1040_v1 = vld [vmem:[%s1329_s1 + $0x1e0] sm:$0xff]   ;;  %v1044_v5 = vld [vmem:[%s1329_s1 + $0x1e8] sm:$0xff]   ;;  %v1047_v8 = vld [vmem:[%s1329_s1 + $0x170] sm:$0xff]  }
  0x13   :  { %v1041_v2 = vld [vmem:[%s1329_s1 + $0x120] sm:$0xff]   ;;  %v1045_v6 = vld [vmem:[%s1329_s1 + $0x128] sm:$0xff]   ;;  %v1048_v9 = vld [vmem:[%s1329_s1 + $0x1f0] sm:$0xff]  }
  0x14   :  { %896 = vmatpush3.bf16.msra.mxu0 %v1008_v18  ;;  %v1042_v3 = vld [vmem:[%s1329_s1 + $0x1a0] sm:$0xff]   ;;  %v1046_v7 = vld [vmem:[%s1329_s1 + $0x1a8] sm:$0xff]  }
  0x15   :  { %918 = vmatpush3.bf16.msra.mxu1 %v1009_v19  ;;  %897 = vmatprep.subr.bf16.mxu0 %v1010_v20  ;;  %v17_v10 = vld [vmem:[%s1328_s0 + $0x8] sm:$0xff] }
  0x16   :  { %919 = vmatprep.subr.bf16.mxu1 %v1011_v21  ;;  %v44_v11 = vrot.slane %v17_v10, %v1211_v41  ;;  %v37_v12 = vcombine.high %v17_v10, %v17_v10 }
  0x18   :  { %898 = vmatpush3.bf16.msra.mxu0 %v1012_v22 }
  0x19   :  { %920 = vmatpush3.bf16.msra.mxu1 %v1013_v23  ;;  %899 = vmatprep.subr.bf16.mxu0 %v1014_v24 }
  0x1a   :  { %921 = vmatprep.subr.bf16.mxu1 %v1015_v25 }
  0x1c   :  { %900 = vmatpush3.bf16.msra.mxu0 %v1016_v26 }
  0x1d   :  { %922 = vmatpush3.bf16.msra.mxu1 %v1017_v27  ;;  %901 = vmatprep.subr.bf16.mxu0 %v1018_v29 }
  0x1e   :  { %923 = vmatprep.subr.bf16.mxu1 %v1019_v30 }
  0x20   :  { %902 = vmatpush3.bf16.msra.mxu0 %v1020_v31 }
  0x21   :  { %924 = vmatpush3.bf16.msra.mxu1 %v1021_v32  ;;  %931 = vmatprep.subr.bf16.mxu0 %v1023_v35 }
  0x22   :  { %953 = vmatprep.subr.bf16.mxu1 %v1024_v38 }
  0x23   :  { %615 = vmatmul.mubr.bf16.vlgmr.msra.gmra.mrb[0].mxu0 %v62_v47 }
  0x24   :  { %655 = vmatmul.mubr.bf16.vlgmr.msra.gmra.mrb[0].mxu1 %v64_v48  ;;  %932 = vmatpush3.bf16.msra.mxu0 %v1025_v46 }
  0x25   :  { %954 = vmatpush3.bf16.msra.mxu1 %v1026_v49  ;;  %933 = vmatprep.subr.bf16.mxu0 %v1027_v52 }
  0x26   :  { %955 = vmatprep.subr.bf16.mxu1 %v1028_v53 }
  0x28   :  { %934 = vmatpush3.bf16.msra.mxu0 %v1029_v54 }
  0x29   :  { %956 = vmatpush3.bf16.msra.mxu1 %v1030_v55  ;;  %935 = vmatprep.subr.bf16.mxu0 %v1031_v56 }
  0x2a   :  { %957 = vmatprep.subr.bf16.mxu1 %v1032_v57 }
  0x2c   :  { %936 = vmatpush3.bf16.msra.mxu0 %v1033_v58 }
  0x2d   :  { %958 = vmatpush3.bf16.msra.mxu1 %v1034_v59  ;;  %937 = vmatprep.subr.bf16.mxu0 %v1035_v60 }
  0x2e   :  { %959 = vmatprep.subr.bf16.mxu1 %v1036_v61 }
  0x30   :  { %938 = vmatpush3.bf16.msra.mxu0 %v1037_v62 }
  0x31   :  { %960 = vmatpush3.bf16.msra.mxu1 %v1038_v63  ;;  %939 = vmatprep.subr.bf16.mxu0 %v1039_v0 }
  0x32   :  { %961 = vmatprep.subr.bf16.mxu1 %v1040_v1 }
  0x34   :  { %940 = vmatpush3.bf16.msra.mxu0 %v1041_v2 }
  0x35   :  { %962 = vmatpush3.bf16.msra.mxu1 %v1042_v3  ;;  %941 = vmatprep.subr.bf16.mxu0 %v1043_v4 }
  0x36   :  { %963 = vmatprep.subr.bf16.mxu1 %v1044_v5 }
  0x37   :  { %8 = vsyncpa [#allocation3], 0  ;;  %v1049_v13 = vld [vmem:[%s1329_s1 + $0x130] sm:$0xff]   ;;  %v52_v15 = vcombine.high %v44_v11, %v44_v11  ;;  %v51_v16 = vrot.slane %v37_v12, %v1211_v41  ;;  %v1051_v17 = vld [vmem:[%s1329_s1 + $0x178] sm:$0xff]   ;;  %v66_v24 = vpack.c.bf16 %v44_v11, %v44_v11  ;;  %v1083_v27 = vmov 0.0  }
  0x38   :  { %942 = vmatpush3.bf16.msra.mxu0 %v1045_v6  ;;  %v1050_v14 = vld [vmem:[%s1329_s1 + $0x1b0] sm:$0xff]   ;;  %v1052_v18 = vld [vmem:[%s1329_s1 + $0x1f8] sm:$0xff]   ;;  %v1056_v26 = vld [vmem:[%s1330_s2] sm:$0xff]   ;;  %vm1084_vm0 = vmmov 0   ;;  %vm760_vm1 = vcmask 261120  }
  0x39   :  { %964 = vmatpush3.bf16.msra.mxu1 %v1046_v7  ;;  %943 = vmatprep.subr.bf16.mxu0 %v1047_v8  ;;  %v67_v19 = vpack.c.bf16 %v52_v15, %v52_v15  ;;  %v53_v20 = vcombine.high %v51_v16, %v51_v16  ;;  %v1053_v21 = vld [vmem:[%s1329_s1 + $0x138] sm:$0xff]   ;;  %v68_v25 = vpack.c.bf16 %v51_v16, %v51_v16  ;;  %v1057_v28 = vld [vmem:[%s1330_s2 + $0x8] sm:$0xff]   ;;  %s1085_s2 = smov [#allocation2]  }
  0x3a   :  { %965 = vmatprep.subr.bf16.mxu1 %v1048_v9  ;;  %v1054_v22 = vld [vmem:[%s1329_s1 + $0x1b8] sm:$0xff]   ;;  %s812_s11 = sshll.u32 %s1085_s2, 4  ;;  %s813_s11 = int_to_ptr.vmem [resolvable:$true] %s812_s11 }
  0x3b   :  { %v69_v23 = vpack.c.bf16 %v53_v20, %v53_v20  ;;  %694 = vmatprep.mubr.bf16.mxu0 %v67_v19  ;;  %s1058_s12 = scalar_lea.vmem %s813_s11, 16  ;;  %s1062_s13 = scalar_lea.vmem %s813_s11, 32 }
  0x3c   :  { %944 = vmatpush3.bf16.msra.mxu0 %v1049_v13  ;;  %p1059_p0 = scmp.ne.s32.totalorder %s813_s11, %s1058_s12  ;;  %p1063_p1 = scmp.lt.s32.totalorder %s813_s11, %s813_s11 }
  0x3d   :  { %966 = vmatpush3.bf16.msra.mxu1 %v1050_v14  ;;  %945 = vmatprep.subr.bf16.mxu0 %v1051_v17  ;;  %p1064_p2 = scmp.lt.s32.totalorder %s1062_s13, %s1058_s12 }
  0x3e   :  { %967 = vmatprep.subr.bf16.mxu1 %v1052_v18  ;;  %734 = vmatprep.mubr.bf16.mxu1 %v69_v23 }
  0x3f   :  { %p1065_p3 = por %p1064_p2, %p1063_p1 }
  0x40   :  { %946 = vmatpush3.bf16.msra.mxu0 %v1053_v21 }
  0x41   :  { %968 = vmatpush3.bf16.msra.mxu1 %v1054_v22  ;;  %978 = vmatprep.subr.bf16.mxu0 %v1083_v27  ;;  %p1066_p4 = pnand %p1065_p3, %p1059_p0 }
  0x43   :  { %695 = vmatmul.mubr.bf16.vlgmr.msra.gmra.mrb[4].mxu0 %v66_v24 }
  0x44   :  { %735 = vmatmul.mubr.bf16.vlgmr.msra.gmra.mrb[4].mxu1 %v68_v25  ;;  %979 = vmatpush3.bf16.msra.mxu0 %v1056_v26 }
  0x45   :  { %980 = vmatprep.subr.bf16.mxu0 %v1083_v27  ;;  %982 = vmatprep.mubr.msk.bf16.mxu0 %vm1084_vm0, %v1083_v27 }
  0x48   :  { %981 = vmatpush3.bf16.msra.mxu0 %v1057_v28 }
  0xf6   :  { %v903_v29 = vpop.f32.mrb[0].mxu0 }
  0xf7   :  { %v925_v30 = vpop.f32.mrb[0].mxu1  ;;  %v904_v31 = vpop.f32.mrb[1].mxu0 }
  0xf8   :  { %v926_v32 = vpop.f32.mrb[1].mxu1  ;;  %v905_v33 = vadd.f32 %v904_v31, %v903_v29  ;;  %v906_v35 = vpop.f32.mrb[2].mxu0 }
  0xf9   :  { %v927_v34 = vadd.f32 %v926_v32, %v925_v30  ;;  %v928_v36 = vpop.f32.mrb[2].mxu1  ;;  %v907_v37 = vpop.f32.mrb[3].mxu0 }
  0xfa   :  { %v929_v38 = vpop.f32.mrb[3].mxu1 }
  0xfb   :  { %v657_v39 = vadd.f32 %v927_v34, %v905_v33 }
 0x116   :  { %v947_v40 = vpop.f32.mrb[4].mxu0 }
 0x117   :  { %v969_v41 = vpop.f32.mrb[4].mxu1  ;;  %v948_v42 = vpop.f32.mrb[5].mxu0 }
 0x118   :  { %v970_v43 = vpop.f32.mrb[5].mxu1  ;;  %v949_v44 = vadd.f32 %v948_v42, %v947_v40  ;;  %v950_v46 = vpop.f32.mrb[6].mxu0 }
 0x119   :  { %v971_v45 = vadd.f32 %v970_v43, %v969_v41  ;;  %v972_v47 = vpop.f32.mrb[6].mxu1  ;;  %v951_v48 = vpop.f32.mrb[7].mxu0 }
 0x11a   :  { %v973_v49 = vpop.f32.mrb[7].mxu1  ;;  %v697_v50 = vadd.f32 %v949_v44, %v657_v39 }
 0x11c   :  { %v737_v51 = vadd.f32 %v971_v45, %v697_v50 }
 0x11e   :  { %v742_v52 = vmax.f32 %v737_v51, 0.0 }
 0x120   :  { %v743_v53 = vpack.c.bf16 %v742_v52, %v742_v52 }
 0x122   :  { %983 = vmatmul.mubr.msk.bf16.vlgmr.msra.gmra.mrb[8].mxu0 %vm760_vm1, %v743_v53 }
 0x1f5   :  { %v798_v54 = vpop.f32.mrb[8].mxu0 }
 0x1f6   :  { %v804_v55 = vpack.c.bf16 %v798_v54, %v798_v54  ;;  %v984_v56 = vpop.f32.mrb[9].mxu0 }
 0x1f7   :  { %v801_v57 = vpop.f32.mrb[10].mxu0 }
 0x1f8   :  { %805 = vst [vmem:[#allocation2] sm:$0x1] %v804_v55  ;;  %v985_v58 = vpop.f32.mrb[11].mxu0 }
 0x1f9   :  { %1069 = shalt.err (!%p1066_p4)
}
 0x1fa   :  { %s1070_s16 = scalar_lea.hbm %s1331_s3, 16 }
 0x1fb   :  { %p1071_p5 = scmp.ne.s32.totalorder %s1331_s3, %s1070_s16  ;;  %p1074_p6 = scmp.lt.u32.totalorder %s1070_s16, %s1331_s3 }
 0x1fd   :  { %p1076_p7 = pnand %p1074_p6, %p1071_p5 }
 0x1ff   :  { %1079 = shalt.err (!%p1076_p7)
}
 0x200   :  { %815 = dma.vmem_to_hbm [thread:$0]  %s813_s11, 16, %s1331_s3, [#allocation3]  }
 0x201   :  { %1080 = dma.done.wait [#allocation3], 16  }
 0x202   :  { %1081 = vsyncadd [#allocation3], 4294967280 }
 0x203   :  { %819 = vsyncpa [#allocation3], 1 }

</bundles_post_ra>
